<compile_context>
chip_gen: v7x
topology: tpu7x:2x2x1
jax: 0.10.0
libtpu: 0.0.40
codegen_flags: <defaults>
</compile_context>

<pallas_src>
import functools

import jax
import jax.numpy as jnp
from jax.experimental import pallas as pl
from jax.experimental.pallas import tpu as pltpu


def _coord_loss_kernel(out_ref, gt_ref, valid_ref, o_ref):
    # Specialized path: is_3D is None.  Block = (TB, J*C).
    a = out_ref[...].astype(jnp.float32)
    b = gt_ref[...].astype(jnp.float32)
    v = valid_ref[...].astype(jnp.float32)
    loss = jnp.abs(a - b) * v
    o_ref[...] = jnp.where(jnp.isnan(loss), jnp.float32(0.0), loss).astype(o_ref.dtype)


def _coord_loss_kernel_3d(out_ref, gt_ref, valid_ref, is3d_ref, o_ref, *, C):
    # Block = (TB, J*C); is3d block = (TB, 1) broadcast along the lane axis.
    a = out_ref[...].astype(jnp.float32)
    b = gt_ref[...].astype(jnp.float32)
    v = valid_ref[...].astype(jnp.float32)
    loss = jnp.abs(a - b) * v                                        # (TB, J*C)
    # channel index within each joint is (flat_idx % C); z-channels are >= 2
    idx = jax.lax.broadcasted_iota(jnp.int32, loss.shape, dimension=1)
    is_z = (idx % C) >= 2
    scale = jnp.where(is_z, is3d_ref[...].astype(jnp.float32), jnp.float32(1.0))
    loss = loss * scale
    o_ref[...] = jnp.where(jnp.isnan(loss), jnp.float32(0.0), loss).astype(o_ref.dtype)


def _choose_batch_tile(B, JC, itemsize=4):
    """Pick a batch tile TB: big contiguous blocks, but VMEM-safe and >=2
    grid steps when B is large (so v7x can use both TensorCores)."""
    lane_padded = ((JC + 127) // 128) * 128
    row_bytes = lane_padded * itemsize
    # ~1 MiB per (double-buffered) stream buffer -> ~<=10 MiB total, fits the
    # v5e 16 MiB scoped-VMEM default and v7x's smaller VMEM with headroom.
    tb_cap = max(8, (1 << 20) // row_bytes)
    if B < 16:
        return B  # single block == full batch dim (satisfies block-shape rule)
    half = -(-B // 2)  # split into >=2 steps for megacore sharding
    tb = min(((half + 7) // 8) * 8, (tb_cap // 8) * 8)
    return max(8, tb)


def coord_loss(coord_out, coord_gt, valid, is_3D=None):
    """Pallas implementation of CoordLoss.forward.

    coord_out, coord_gt, valid: (B, J, C) float arrays
    is_3D: optional (B,) array (bool/float); if None, z is left unscaled.
    """
    B, J, C = coord_out.shape
    JC = J * C
    out_dtype = jnp.result_type(coord_out.dtype, coord_gt.dtype, valid.dtype)

    # Free, contiguous reshapes to a lane-denser (B, J*C) layout.
    co = coord_out.reshape(B, JC)
    cg = coord_gt.reshape(B, JC)
    va = valid.reshape(B, JC)

    TB = _choose_batch_tile(B, JC, itemsize=jnp.dtype(out_dtype).itemsize)
    grid = (pl.cdiv(B, TB),)

    data_spec = pl.BlockSpec((TB, JC), lambda i: (i, 0))

    if is_3D is None:
        kernel = _coord_loss_kernel
        in_specs = [data_spec, data_spec, data_spec]
        args = (co, cg, va)
    else:
        is3d = is_3D.astype(jnp.float32).reshape(B, 1)
        kernel = functools.partial(_coord_loss_kernel_3d, C=C)
        in_specs = [data_spec, data_spec, data_spec,
                    pl.BlockSpec((TB, 1), lambda i: (i, 0))]
        args = (co, cg, va, is3d)

    out = pl.pallas_call(
        kernel,
        out_shape=jax.ShapeDtypeStruct((B, JC), out_dtype),
        grid_spec=pltpu.PrefetchScalarGridSpec(
            num_scalar_prefetch=0,
            grid=grid,
            in_specs=in_specs,
            out_specs=pl.BlockSpec((TB, JC), lambda i: (i, 0)),
        ),
        compiler_params=pltpu.CompilerParams(
            dimension_semantics=("parallel",)),
    )(*args)

    return out.reshape(B, J, C)


def coord_loss_ref(coord_out, coord_gt, valid, is_3D=None):
    """Pure-JAX reference matching the PyTorch module."""
    loss = jnp.abs(coord_out - coord_gt) * valid
    if is_3D is not None:
        scale = is_3D.astype(jnp.float32)[:, None, None]
        loss_z = loss[:, :, 2:] * scale
        loss = jnp.concatenate((loss[:, :, :2], loss_z), axis=2)
    return jnp.where(jnp.isnan(loss), 0.0, loss)


def _run_case(key, B, J, C):
    k1, k2, k3, k4 = jax.random.split(key, 4)
    coord_out = jax.random.normal(k1, (B, J, C), dtype=jnp.float32)
    coord_gt = jax.random.normal(k2, (B, J, C), dtype=jnp.float32)
    valid = (jax.random.uniform(k3, (B, J, C)) > 0.3).astype(jnp.float32)
    is_3D = (jax.random.uniform(k4, (B,)) > 0.5).astype(jnp.float32)

    # inject a NaN to exercise the nan-zeroing path
    coord_gt = coord_gt.at[0, 0, 0].set(jnp.nan)

    # with is_3D
    out = coord_loss(coord_out, coord_gt, valid, is_3D)
    jax.block_until_ready(out)
    ref = coord_loss_ref(coord_out, coord_gt, valid, is_3D)
    assert out.shape == ref.shape
    assert jnp.allclose(out, ref, atol=1e-6), f"mismatch vs reference (is_3D), B={B}"

    # without is_3D (specialized kernel)
    out2 = coord_loss(coord_out, coord_gt, valid, None)
    jax.block_until_ready(out2)
    ref2 = coord_loss_ref(coord_out, coord_gt, valid, None)
    assert jnp.allclose(out2, ref2, atol=1e-6), f"mismatch vs reference (no is_3D), B={B}"


if __name__ == "__main__":
    key = jax.random.PRNGKey(0)
    k_a, k_b = jax.random.split(key, 2)

    # small case: single grid step, block == full batch
    _run_case(k_a, B=2, J=8, C=3)

    # larger case: batch-chunked grid (2 steps of TB=16) exercising the
    # chunked BlockSpecs and in-kernel is_3D broadcast
    _run_case(k_b, B=32, J=8, C=3)

    print("KERNEL_OK")
</pallas_src>

<mosaic_0001>
module attributes {stable_mosaic.version = 11 : i64} {
  func.func @_coord_loss_kernel_3d(%arg0: i32, %arg1: memref<2x24xf32, #tpu.memory_space<vmem>>, %arg2: memref<2x24xf32, #tpu.memory_space<vmem>>, %arg3: memref<2x24xf32, #tpu.memory_space<vmem>>, %arg4: memref<2x1xf32, #tpu.memory_space<vmem>>, %arg5: memref<2x24xf32, #tpu.memory_space<vmem>>) attributes {dimension_semantics = [#tpu.dimension_semantics<parallel>], iteration_bounds = array<i64: 1>, scalar_prefetch = 0 : i64, scratch_operands = 0 : i64, tpu.core_type = #tpu.core_type<tc>, window_params = [{transform_indices = @transform_0, window_bounds = array<i64: 2, 24>}, {transform_indices = @transform_1, window_bounds = array<i64: 2, 24>}, {transform_indices = @transform_2, window_bounds = array<i64: 2, 24>}, {transform_indices = @transform_3, window_bounds = array<i64: 2, 1>}, {transform_indices = @transform_4, window_bounds = array<i64: 2, 24>}]} {
    %c0 = arith.constant 0 : index
    %c0_0 = arith.constant 0 : index
    %0 = vector.load %arg1[%c0, %c0_0] : memref<2x24xf32, #tpu.memory_space<vmem>>, vector<2x24xf32>
    %c0_1 = arith.constant 0 : index
    %c0_2 = arith.constant 0 : index
    %1 = vector.load %arg2[%c0_1, %c0_2] : memref<2x24xf32, #tpu.memory_space<vmem>>, vector<2x24xf32>
    %c0_3 = arith.constant 0 : index
    %c0_4 = arith.constant 0 : index
    %2 = vector.load %arg3[%c0_3, %c0_4] : memref<2x24xf32, #tpu.memory_space<vmem>>, vector<2x24xf32>
    %3 = arith.subf %0, %1 : vector<2x24xf32>
    %4 = math.absf %3 : vector<2x24xf32>
    %5 = arith.mulf %4, %2 : vector<2x24xf32>
    %6 = tpu.iota {dimensions = array<i32: 1>} : vector<2x24xi32>
    %c3_i32 = arith.constant 3 : i32
    %c0_i32 = arith.constant 0 : i32
    %7 = arith.cmpi eq, %c3_i32, %c0_i32 : i32
    %c1_i32 = arith.constant 1 : i32
    %8 = arith.select %7, %c1_i32, %c3_i32 : i32
    %9 = vector.broadcast %8 : i32 to vector<2x24xi32>
    %10 = arith.remsi %6, %9 : vector<2x24xi32>
    %c0_i32_5 = arith.constant 0 : i32
    %11 = vector.broadcast %c0_i32_5 : i32 to vector<2x24xi32>
    %12 = arith.cmpi ne, %10, %11 : vector<2x24xi32>
    %c0_i32_6 = arith.constant 0 : i32
    %13 = vector.broadcast %c0_i32_6 : i32 to vector<2x24xi32>
    %14 = arith.cmpi slt, %10, %13 : vector<2x24xi32>
    %c0_i32_7 = arith.constant 0 : i32
    %15 = arith.cmpi slt, %8, %c0_i32_7 : i32
    %16 = vector.broadcast %15 : i1 to vector<2x24xi1>
    %17 = vector.broadcast %16 : vector<2x24xi1> to vector<2x24xi1>
    %18 = arith.xori %14, %17 : vector<2x24xi1>
    %19 = arith.andi %18, %12 : vector<2x24xi1>
    %20 = vector.broadcast %8 : i32 to vector<2x24xi32>
    %21 = arith.addi %10, %20 : vector<2x24xi32>
    %22 = arith.select %19, %21, %10 : vector<2x24xi1>, vector<2x24xi32>
    %c2_i32 = arith.constant 2 : i32
    %23 = vector.broadcast %c2_i32 : i32 to vector<2x24xi32>
    %24 = arith.cmpi sge, %22, %23 : vector<2x24xi32>
    %c0_8 = arith.constant 0 : index
    %c0_9 = arith.constant 0 : index
    %25 = vector.load %arg4[%c0_8, %c0_9] : memref<2x1xf32, #tpu.memory_space<vmem>>, vector<2x1xf32>
    %cst = arith.constant 1.000000e+00 : f32
    %26 = vector.shape_cast %25 : vector<2x1xf32> to vector<2x1xf32>
    %27 = vector.broadcast %26 : vector<2x1xf32> to vector<2x24xf32>
    %28 = vector.broadcast %cst : f32 to vector<2x24xf32>
    %29 = arith.select %24, %27, %28 : vector<2x24xi1>, vector<2x24xf32>
    %30 = arith.mulf %5, %29 : vector<2x24xf32>
    %31 = arith.cmpf one, %30, %30 : vector<2x24xf32>
    %cst_10 = arith.constant 0.000000e+00 : f32
    %32 = vector.broadcast %cst_10 : f32 to vector<2x24xf32>
    %33 = arith.select %31, %32, %30 : vector<2x24xi1>, vector<2x24xf32>
    %c0_11 = arith.constant 0 : index
    %c0_12 = arith.constant 0 : index
    %34 = vector.load %arg5[%c0_11, %c0_12] : memref<2x24xf32, #tpu.memory_space<vmem>>, vector<2x24xf32>
    tpu.vector_store %arg5[%c0_11, %c0_12], %33 {strides = array<i32>} : memref<2x24xf32, #tpu.memory_space<vmem>>, vector<2x24xf32>,
    return
  }
  func.func @transform_0(%arg0: i32) -> (i32, i32) {
    %c0_i32 = arith.constant 0 : i32
    %c0_i32_0 = arith.constant 0 : i32
    return %arg0, %c0_i32 : i32, i32
  }
  func.func @transform_1(%arg0: i32) -> (i32, i32) {
    %c0_i32 = arith.constant 0 : i32
    %c0_i32_0 = arith.constant 0 : i32
    return %arg0, %c0_i32 : i32, i32
  }
  func.func @transform_2(%arg0: i32) -> (i32, i32) {
    %c0_i32 = arith.constant 0 : i32
    %c0_i32_0 = arith.constant 0 : i32
    return %arg0, %c0_i32 : i32, i32
  }
  func.func @transform_3(%arg0: i32) -> (i32, i32) {
    %c0_i32 = arith.constant 0 : i32
    %c0_i32_0 = arith.constant 0 : i32
    return %arg0, %c0_i32 : i32, i32
  }
  func.func @transform_4(%arg0: i32) -> (i32, i32) {
    %c0_i32 = arith.constant 0 : i32
    %c0_i32_0 = arith.constant 0 : i32
    return %arg0, %c0_i32 : i32, i32
  }
}

</mosaic_0001>

<bundles_post_ra>
// kernel: tpu_custom_call.1
= control target key start
LH: loop header
LB: loop body
LE: loop exit
PB: predicated region body
PF: predicated region fallthrough
CT: control target
= control target key end

     0   :  { %v98_v1 = vmov 0   ;;  %s153_s0 = inlined_call_operand.vmem [shape: f32[2,24], index: 0, kind: input, shape index: {}]   ;;  %s154_s1 = inlined_call_operand.vmem [shape: f32[2,24], index: 1, kind: input, shape index: {}]   ;;  %s155_s2 = inlined_call_operand.vmem [shape: f32[2,24], index: 2, kind: input, shape index: {}]   ;;  %s156_s3 = inlined_call_operand.vmem [shape: f32[2,1], index: 3, kind: input, shape index: {}]   ;;  %s157_s4 = inlined_call_operand.hbm [shape: f32[2,24], index: 4, kind: output, shape index: {}]  }
   0x1   :  { %v43_v0 = vld [vmem:[%s156_s3] sm:$0x3]  ;;  %73 = vset.pattern.permute.xlu0 %v98_v1 }
   0x2   :  { %9 = vsyncpa [#allocation3], 0  ;;  %46 = vperm.xlu0 %73, %v43_v0   ;;  %v24_v2 = vlaneseq  ;;  %v18_v9 = vld [vmem:[%s153_s0] sm:$0x3]  ;;  %s99_s0 = smov [#allocation2]   ;;  %vm53_vm4 = vcmask 189440  }
   0x3   :  { %v19_v10 = vld [vmem:[%s154_s1] sm:$0x3]  ;;  %s61_s22 = sshll.u32 %s99_s0, 4  ;;  %s62_s22 = int_to_ptr.vmem [resolvable:$true] %s61_s22 }
   0x4   :  { %v25_v3 = vand.u32 127, %v24_v2  ;;  %v21_v11 = vsub.f32 %v18_v9, %v19_v10  ;;  %v20_v14 = vld [vmem:[%s155_s2] sm:$0x3]  ;;  %s74_s1 = scalar_lea.vmem %s62_s22, 32  ;;  %p79_p1 = scmp.lt.s32.totalorder %s62_s22, %s62_s22 }
   0x5   :  { %p75_p0 = scmp.ne.s32.totalorder %s62_s22, %s74_s1  ;;  %p80_p2 = scmp.lt.s32.totalorder %s74_s1, %s74_s1 }
   0x6   :  { %v128_v4 = vmul.u32.u64.low 2863311531, %v25_v3  ;;  %v129_v5 = vmul.u32.u64.high 2863311531, %v25_v3, %v128_v4  ;;  %v22_v13 = vand.u32 2147483647, %v21_v11 }
   0x7   :  { %p81_p3 = por %p80_p2, %p79_p1 }
   0x8   :  { %v32_v6 = vshrl.u32 %v129_v5, 1  ;;  %v23_v16 = vmul.f32 %v22_v13, %v20_v14 }
   0x9   :  { %p82_p4 = pnand %p81_p3, %p75_p0 }
   0xa   :  { %v33_v7 = vmul.u32 3, %v32_v6 }
   0xc   :  { %v34_v8 = vsub.s32 %v25_v3, %v33_v7 }
   0xe   :  { %vm37_vm0 = vcmp.ne.s32.totalorder %v34_v8, 0  ;;  %vm38_vm1 = vcmp.lt.s32.totalorder %v34_v8, 0  ;;  %v40_v12 = vadd.s32 3, %v34_v8 }
   0xf   :  { %vm39_vm2 = vmand %vm38_vm1, %vm37_vm0 }
  0x10   :  { %v41_v15 = vsel %vm39_vm2, %v40_v12, %v34_v8 }
  0x11   :  { %vm42_vm3 = vcmp.ge.s32.totalorder %v41_v15, 2 }
  0x81   :  { %v47_v17 = vpop.permute.xlu0 %46 }
  0x82   :  { %v49_v18 = vsel %vm42_vm3, %v47_v17, 1.0 }
  0x83   :  { %v50_v19 = vmul.f32 %v49_v18, %v23_v16 }
  0x85   :  { %vm51_vm5 = vcmp.ne.f32.partialorder %v50_v19, %v50_v19 }
  0x86   :  { %v52_v20 = vsel %vm51_vm5, 0.0, %v50_v19 }
  0x87   :  { %54 = vst.msk [vmem:[#allocation2] sm:$0x3] %vm53_vm4, %v52_v20 }
  0x88   :  { %85 = shalt.err (!%p82_p4)
}
  0x89   :  { %s86_s24 = scalar_lea.hbm %s157_s4, 32 }
  0x8a   :  { %p87_p5 = scmp.ne.s32.totalorder %s157_s4, %s86_s24  ;;  %p90_p6 = scmp.lt.u32.totalorder %s86_s24, %s157_s4 }
  0x8c   :  { %p92_p7 = pnand %p90_p6, %p87_p5 }
  0x8e   :  { %95 = shalt.err (!%p92_p7)
}
  0x8f   :  { %64 = dma.vmem_to_hbm [thread:$0]  %s62_s22, 32, %s157_s4, [#allocation3]  }
  0x90   :  { %96 = dma.done.wait [#allocation3], 32  }
  0x91   :  { %97 = vsyncadd [#allocation3], 4294967264 }
  0x92   :  { %68 = vsyncpa [#allocation3], 1 }

</bundles_post_ra>
